<compile_context>
chip_gen: v7x
topology: tpu7x:2x2x1
jax: 0.10.0
libtpu: 0.0.40
codegen_flags: <defaults>
</compile_context>

<pallas_src>
import functools

import jax
import jax.numpy as jnp
from jax.experimental import pallas as pl
from jax.experimental.pallas import tpu as pltpu


def _make_ce_kernel(n_inputs: int, ignore_index: int):
    """Builds a kernel computing sum/count of softmax-CE over n_inputs logit tensors."""

    def kernel(*refs):
        labels_ref = refs[0]
        logit_refs = refs[1:1 + n_inputs]
        out_sum_ref = refs[1 + n_inputs]
        out_cnt_ref = refs[2 + n_inputs]
        acc_sum = refs[3 + n_inputs]
        acc_cnt = refs[4 + n_inputs]

        p = pl.program_id(1)

        @pl.when(p == 0)
        def _():
            acc_sum[...] = jnp.zeros_like(acc_sum)
            acc_cnt[...] = jnp.zeros_like(acc_cnt)

        lbl = labels_ref[0]                      # (1, TILE_P) int32, lane-dense
        valid = lbl != ignore_index              # padding + ignore_index mask

        loss_vec = jnp.zeros(lbl.shape, jnp.float32)
        # Python-unrolled over the (1 or 2) fused logit tensors.
        for logits_ref in logit_refs:
            x = logits_ref[0].astype(jnp.float32)        # (C, TILE_P), C on sublanes
            m = jnp.max(x, axis=0, keepdims=True)        # (1, TILE_P)
            lse = jnp.log(jnp.sum(jnp.exp(x - m), axis=0, keepdims=True)) + m
            cls = jax.lax.broadcasted_iota(jnp.int32, x.shape, 0)
            correct = jnp.sum(jnp.where(cls == lbl, x, 0.0),
                              axis=0, keepdims=True)     # (1, TILE_P)
            loss_vec = loss_vec + (lse - correct)

        loss_vec = jnp.where(valid, loss_vec, 0.0)
        # Elementwise vector accumulation (VPU); no per-step cross-lane reduce.
        acc_sum[...] = acc_sum[...] + loss_vec
        acc_cnt[...] = acc_cnt[...] + valid.astype(jnp.float32)

        @pl.when(p == pl.num_programs(1) - 1)
        def _():
            out_sum_ref[...] = jnp.reshape(jnp.sum(acc_sum[...]), (1, 1, 1))
            out_cnt_ref[...] = jnp.reshape(jnp.sum(acc_cnt[...]), (1, 1, 1))

    return kernel


def _pick_tile(hw: int, c: int, n_inputs: int, itemsize: int,
               max_tile: int = 32768, io_budget: int = 16 * 1024 * 1024) -> int:
    """Largest 128-multiple pixel tile keeping double-buffered I/O under budget."""
    per_px = n_inputs * c * itemsize + 4          # logits + int32 label per pixel
    tile = (io_budget // (2 * per_px)) // 128 * 128
    tile = max(128, min(tile, max_tile))
    hw_up = ((hw + 127) // 128) * 128
    return min(tile, hw_up)


def _ce_sum_count(logits_list, gt, ignore_index: int = -100):
    """Returns (sum of per-pixel CE over all inputs, count of valid pixels)."""
    n, c, h, w = logits_list[0].shape
    hw = h * w
    n_inputs = len(logits_list)
    itemsize = jnp.dtype(logits_list[0].dtype).itemsize

    tile = _pick_tile(hw, c, n_inputs, itemsize)
    hw_pad = -(-hw // tile) * tile

    # Free reshapes of the contiguous NCHW / NHW tensors (no transpose).
    logits3 = [x.reshape(n, c, hw) for x in logits_list]
    labels3 = gt.reshape(n, 1, hw).astype(jnp.int32)

    pad = hw_pad - hw
    if pad:
        logits3 = [jnp.pad(x, ((0, 0), (0, 0), (0, pad))) for x in logits3]
        labels3 = jnp.pad(labels3, ((0, 0), (0, 0), (0, pad)),
                          constant_values=ignore_index)

    grid = (n, hw_pad // tile)

    in_specs = (
        [pl.BlockSpec((1, 1, tile), lambda i, p: (i, 0, p))]
        + [pl.BlockSpec((1, c, tile), lambda i, p: (i, 0, p))
           for _ in range(n_inputs)]
    )

    out_sum, out_cnt = pl.pallas_call(
        _make_ce_kernel(n_inputs, ignore_index),
        out_shape=(jax.ShapeDtypeStruct((n, 1, 1), jnp.float32),
                   jax.ShapeDtypeStruct((n, 1, 1), jnp.float32)),
        grid_spec=pltpu.PrefetchScalarGridSpec(
            num_scalar_prefetch=0,
            grid=grid,
            in_specs=in_specs,
            out_specs=[pl.BlockSpec((1, 1, 1), lambda i, p: (i, 0, 0)),
                       pl.BlockSpec((1, 1, 1), lambda i, p: (i, 0, 0))],
            scratch_shapes=[pltpu.VMEM((1, tile), jnp.float32),
                            pltpu.VMEM((1, tile), jnp.float32)],
        ),
        compiler_params=pltpu.CompilerParams(
            dimension_semantics=("parallel", "arbitrary"),
            vmem_limit_bytes=32 * 1024 * 1024,
        ),
    )(labels3, *logits3)

    return jnp.sum(out_sum), jnp.sum(out_cnt)


@functools.partial(jax.jit, static_argnames=("use_auxiliary", "ignore_index"))
def caculate_t_loss(pred: dict, gt: jax.Array, use_auxiliary: bool = True,
                    ignore_index: int = -100) -> jax.Array:
    """Forward pass of CaculateTLoss with CE trunk/auxiliary criteria (fused)."""
    logits_list = [pred["trunk_out"]]
    if use_auxiliary and "auxiliary_out" in pred:
        logits_list.append(pred["auxiliary_out"])
    # TODO(synk): the PyTorch module accepts arbitrary criteria; only
    # CrossEntropyLoss(mean, ignore_index) is implemented here.
    loss_sum, valid_cnt = _ce_sum_count(logits_list, gt, ignore_index)
    # trunk_mean + aux_mean = (sum_trunk + sum_aux) / valid_count (same gt).
    return loss_sum / valid_cnt


if __name__ == "__main__":
    key = jax.random.PRNGKey(0)
    k1, k2, k3 = jax.random.split(key, 3)

    N, C, H, W = 2, 4, 16, 16
    trunk_out = jax.random.normal(k1, (N, C, H, W), dtype=jnp.float32)
    auxiliary_out = jax.random.normal(k2, (N, C, H, W), dtype=jnp.float32)
    gt = jax.random.randint(k3, (N, H, W), 0, C, dtype=jnp.int32)

    pred = {"trunk_out": trunk_out, "auxiliary_out": auxiliary_out}

    loss = caculate_t_loss(pred, gt)
    jax.block_until_ready(loss)

    # pure-JAX reference check (nn.CrossEntropyLoss, mean reduction)
    def ce_ref(logits, labels):
        x = jnp.transpose(logits, (0, 2, 3, 1)).reshape(-1, C)
        l = labels.reshape(-1)
        logp = jax.nn.log_softmax(x, axis=-1)
        return -jnp.mean(jnp.take_along_axis(logp, l[:, None], axis=-1))

    ref = ce_ref(trunk_out, gt) + ce_ref(auxiliary_out, gt)
    assert jnp.allclose(loss, ref, rtol=1e-5, atol=1e-5), (loss, ref)

    print("KERNEL_OK")
</pallas_src>

<mosaic_0001>
module attributes {stable_mosaic.version = 11 : i64} {
  func.func @kernel(%arg0: i32, %arg1: i32, %arg2: memref<1x1x256xi32, #tpu.memory_space<vmem>>, %arg3: memref<1x4x256xf32, #tpu.memory_space<vmem>>, %arg4: memref<1x4x256xf32, #tpu.memory_space<vmem>>, %arg5: memref<1x1x1xf32, #tpu.memory_space<vmem>>, %arg6: memref<1x1x1xf32, #tpu.memory_space<vmem>>, %arg7: memref<1x256xf32, #tpu.memory_space<vmem>>, %arg8: memref<1x256xf32, #tpu.memory_space<vmem>>) attributes {dimension_semantics = [#tpu.dimension_semantics<parallel>, #tpu.dimension_semantics<arbitrary>], iteration_bounds = array<i64: 2, 1>, scalar_prefetch = 0 : i64, scratch_operands = 2 : i64, tpu.core_type = #tpu.core_type<tc>, window_params = [{transform_indices = @transform_0, window_bounds = array<i64: 1, 1, 256>}, {transform_indices = @transform_1, window_bounds = array<i64: 1, 4, 256>}, {transform_indices = @transform_2, window_bounds = array<i64: 1, 4, 256>}, {transform_indices = @transform_3, window_bounds = array<i64: 1, 1, 1>}, {transform_indices = @transform_4, window_bounds = array<i64: 1, 1, 1>}]} {
    %c0_i32 = arith.constant 0 : i32
    %0 = arith.cmpi eq, %arg1, %c0_i32 : i32
    %1 = arith.extui %0 : i1 to i32
    %c0_i32_0 = arith.constant 0 : i32
    %2 = arith.cmpi ne, %1, %c0_i32_0 : i32
    scf.if %2 {
      %cst_28 = arith.constant 0.000000e+00 : f32
      %61 = vector.broadcast %cst_28 : f32 to vector<1x256xf32>
      %c0_29 = arith.constant 0 : index
      %c0_30 = arith.constant 0 : index
      %62 = vector.load %arg7[%c0_29, %c0_30] : memref<1x256xf32, #tpu.memory_space<vmem>>, vector<1x256xf32>
      tpu.vector_store %arg7[%c0_29, %c0_30], %61 {strides = array<i32>} : memref<1x256xf32, #tpu.memory_space<vmem>>, vector<1x256xf32>,
      %cst_31 = arith.constant 0.000000e+00 : f32
      %63 = vector.broadcast %cst_31 : f32 to vector<1x256xf32>
      %c0_32 = arith.constant 0 : index
      %c0_33 = arith.constant 0 : index
      %64 = vector.load %arg8[%c0_32, %c0_33] : memref<1x256xf32, #tpu.memory_space<vmem>>, vector<1x256xf32>
      tpu.vector_store %arg8[%c0_32, %c0_33], %63 {strides = array<i32>} : memref<1x256xf32, #tpu.memory_space<vmem>>, vector<1x256xf32>,
    } else {
    }
    %c0 = arith.constant 0 : index
    %c0_1 = arith.constant 0 : index
    %c0_2 = arith.constant 0 : index
    %3 = vector.load %arg2[%c0, %c0_1, %c0_2] : memref<1x1x256xi32, #tpu.memory_space<vmem>>, vector<1x1x256xi32>
    %4 = vector.shape_cast %3 : vector<1x1x256xi32> to vector<1x256xi32>
    %c-100_i32 = arith.constant -100 : i32
    %5 = vector.broadcast %c-100_i32 : i32 to vector<1x256xi32>
    %6 = arith.cmpi ne, %4, %5 : vector<1x256xi32>
    %cst = arith.constant 0.000000e+00 : f32
    %7 = vector.broadcast %cst : f32 to vector<1x256xf32>
    %c0_3 = arith.constant 0 : index
    %c0_4 = arith.constant 0 : index
    %c0_5 = arith.constant 0 : index
    %8 = vector.load %arg3[%c0_3, %c0_4, %c0_5] : memref<1x4x256xf32, #tpu.memory_space<vmem>>, vector<1x4x256xf32>
    %9 = vector.shape_cast %8 : vector<1x4x256xf32> to vector<4x256xf32>
    %cst_6 = arith.constant dense<0xFF800000> : vector<256xf32>
    %10 = vector.multi_reduction <maximumf>, %9, %cst_6 [0] : vector<4x256xf32> to vector<256xf32>
    %11 = vector.shape_cast %10 : vector<256xf32> to vector<1x256xf32>
    %12 = vector.broadcast %11 : vector<1x256xf32> to vector<4x256xf32>
    %13 = arith.subf %9, %12 : vector<4x256xf32>
    %14 = math.exp %13 : vector<4x256xf32>
    %cst_7 = arith.constant dense<0.000000e+00> : vector<256xf32>
    %15 = vector.multi_reduction <add>, %14, %cst_7 [0] : vector<4x256xf32> to vector<256xf32>
    %16 = vector.shape_cast %15 : vector<256xf32> to vector<1x256xf32>
    %17 = math.log %16 : vector<1x256xf32>
    %18 = arith.addf %17, %11 : vector<1x256xf32>
    %19 = tpu.iota {dimensions = array<i32: 0>} : vector<4x256xi32>
    %20 = vector.broadcast %4 : vector<1x256xi32> to vector<4x256xi32>
    %21 = arith.cmpi eq, %19, %20 : vector<4x256xi32>
    %cst_8 = arith.constant 0.000000e+00 : f32
    %22 = vector.broadcast %cst_8 : f32 to vector<4x256xf32>
    %23 = arith.select %21, %9, %22 : vector<4x256xi1>, vector<4x256xf32>
    %cst_9 = arith.constant dense<0.000000e+00> : vector<256xf32>
    %24 = vector.multi_reduction <add>, %23, %cst_9 [0] : vector<4x256xf32> to vector<256xf32>
    %25 = vector.shape_cast %24 : vector<256xf32> to vector<1x256xf32>
    %26 = arith.subf %18, %25 : vector<1x256xf32>
    %27 = arith.addf %7, %26 : vector<1x256xf32>
    %c0_10 = arith.constant 0 : index
    %c0_11 = arith.constant 0 : index
    %c0_12 = arith.constant 0 : index
    %28 = vector.load %arg4[%c0_10, %c0_11, %c0_12] : memref<1x4x256xf32, #tpu.memory_space<vmem>>, vector<1x4x256xf32>
    %29 = vector.shape_cast %28 : vector<1x4x256xf32> to vector<4x256xf32>
    %cst_13 = arith.constant dense<0xFF800000> : vector<256xf32>
    %30 = vector.multi_reduction <maximumf>, %29, %cst_13 [0] : vector<4x256xf32> to vector<256xf32>
    %31 = vector.shape_cast %30 : vector<256xf32> to vector<1x256xf32>
    %32 = vector.broadcast %31 : vector<1x256xf32> to vector<4x256xf32>
    %33 = arith.subf %29, %32 : vector<4x256xf32>
    %34 = math.exp %33 : vector<4x256xf32>
    %cst_14 = arith.constant dense<0.000000e+00> : vector<256xf32>
    %35 = vector.multi_reduction <add>, %34, %cst_14 [0] : vector<4x256xf32> to vector<256xf32>
    %36 = vector.shape_cast %35 : vector<256xf32> to vector<1x256xf32>
    %37 = math.log %36 : vector<1x256xf32>
    %38 = arith.addf %37, %31 : vector<1x256xf32>
    %39 = tpu.iota {dimensions = array<i32: 0>} : vector<4x256xi32>
    %40 = vector.broadcast %4 : vector<1x256xi32> to vector<4x256xi32>
    %41 = arith.cmpi eq, %39, %40 : vector<4x256xi32>
    %cst_15 = arith.constant 0.000000e+00 : f32
    %42 = vector.broadcast %cst_15 : f32 to vector<4x256xf32>
    %43 = arith.select %41, %29, %42 : vector<4x256xi1>, vector<4x256xf32>
    %cst_16 = arith.constant dense<0.000000e+00> : vector<256xf32>
    %44 = vector.multi_reduction <add>, %43, %cst_16 [0] : vector<4x256xf32> to vector<256xf32>
    %45 = vector.shape_cast %44 : vector<256xf32> to vector<1x256xf32>
    %46 = arith.subf %38, %45 : vector<1x256xf32>
    %47 = arith.addf %27, %46 : vector<1x256xf32>
    %cst_17 = arith.constant 0.000000e+00 : f32
    %48 = vector.broadcast %cst_17 : f32 to vector<1x256xf32>
    %49 = arith.select %6, %47, %48 : vector<1x256xi1>, vector<1x256xf32>
    %c0_18 = arith.constant 0 : index
    %c0_19 = arith.constant 0 : index
    %50 = vector.load %arg7[%c0_18, %c0_19] : memref<1x256xf32, #tpu.memory_space<vmem>>, vector<1x256xf32>
    %51 = arith.addf %50, %49 : vector<1x256xf32>
    %c0_20 = arith.constant 0 : index
    %c0_21 = arith.constant 0 : index
    %52 = vector.load %arg7[%c0_20, %c0_21] : memref<1x256xf32, #tpu.memory_space<vmem>>, vector<1x256xf32>
    tpu.vector_store %arg7[%c0_20, %c0_21], %51 {strides = array<i32>} : memref<1x256xf32, #tpu.memory_space<vmem>>, vector<1x256xf32>,
    %c0_22 = arith.constant 0 : index
    %c0_23 = arith.constant 0 : index
    %53 = vector.load %arg8[%c0_22, %c0_23] : memref<1x256xf32, #tpu.memory_space<vmem>>, vector<1x256xf32>
    %54 = arith.extui %6 : vector<1x256xi1> to vector<1x256xi32>
    %55 = arith.sitofp %54 : vector<1x256xi32> to vector<1x256xf32>
    %56 = arith.addf %53, %55 : vector<1x256xf32>
    %c0_24 = arith.constant 0 : index
    %c0_25 = arith.constant 0 : index
    %57 = vector.load %arg8[%c0_24, %c0_25] : memref<1x256xf32, #tpu.memory_space<vmem>>, vector<1x256xf32>
    tpu.vector_store %arg8[%c0_24, %c0_25], %56 {strides = array<i32>} : memref<1x256xf32, #tpu.memory_space<vmem>>, vector<1x256xf32>,
    %c0_i32_26 = arith.constant 0 : i32
    %58 = arith.cmpi eq, %arg1, %c0_i32_26 : i32
    %59 = arith.extui %58 : i1 to i32
    %c0_i32_27 = arith.constant 0 : i32
    %60 = arith.cmpi ne, %59, %c0_i32_27 : i32
    scf.if %60 {
      %c0_28 = arith.constant 0 : index
      %c0_29 = arith.constant 0 : index
      %61 = vector.load %arg7[%c0_28, %c0_29] : memref<1x256xf32, #tpu.memory_space<vmem>>, vector<1x256xf32>
      %62 = vector.shape_cast %61 : vector<1x256xf32> to vector<1x1x256xf32>
      %cst_30 = arith.constant dense<0.000000e+00> : vector<1xf32>
      %63 = vector.multi_reduction <add>, %62, %cst_30 [1, 2] : vector<1x1x256xf32> to vector<1xf32>
      %64 = vector.shape_cast %63 : vector<1xf32> to vector<1x1x1xf32>
      %65 = vector.extract %64[0, 0, 0] : f32 from vector<1x1x1xf32>
      %66 = vector.broadcast %65 : f32 to vector<1x1x1xf32>
      %c0_31 = arith.constant 0 : index
      %c0_32 = arith.constant 0 : index
      %c0_33 = arith.constant 0 : index
      %67 = vector.load %arg5[%c0_31, %c0_32, %c0_33] : memref<1x1x1xf32, #tpu.memory_space<vmem>>, vector<1x1x1xf32>
      tpu.vector_store %arg5[%c0_31, %c0_32, %c0_33], %66 {strides = array<i32>} : memref<1x1x1xf32, #tpu.memory_space<vmem>>, vector<1x1x1xf32>,
      %c0_34 = arith.constant 0 : index
      %c0_35 = arith.constant 0 : index
      %68 = vector.load %arg8[%c0_34, %c0_35] : memref<1x256xf32, #tpu.memory_space<vmem>>, vector<1x256xf32>
      %69 = vector.shape_cast %68 : vector<1x256xf32> to vector<1x1x256xf32>
      %cst_36 = arith.constant dense<0.000000e+00> : vector<1xf32>
      %70 = vector.multi_reduction <add>, %69, %cst_36 [1, 2] : vector<1x1x256xf32> to vector<1xf32>
      %71 = vector.shape_cast %70 : vector<1xf32> to vector<1x1x1xf32>
      %72 = vector.extract %71[0, 0, 0] : f32 from vector<1x1x1xf32>
      %73 = vector.broadcast %72 : f32 to vector<1x1x1xf32>
      %c0_37 = arith.constant 0 : index
      %c0_38 = arith.constant 0 : index
      %c0_39 = arith.constant 0 : index
      %74 = vector.load %arg6[%c0_37, %c0_38, %c0_39] : memref<1x1x1xf32, #tpu.memory_space<vmem>>, vector<1x1x1xf32>
      tpu.vector_store %arg6[%c0_37, %c0_38, %c0_39], %73 {strides = array<i32>} : memref<1x1x1xf32, #tpu.memory_space<vmem>>, vector<1x1x1xf32>,
    } else {
    }
    return
  }
  func.func @transform_0(%arg0: i32, %arg1: i32) -> (i32, i32, i32) {
    %c0_i32 = arith.constant 0 : i32
    %c0_i32_0 = arith.constant 0 : i32
    return %arg0, %c0_i32, %arg1 : i32, i32, i32
  }
  func.func @transform_1(%arg0: i32, %arg1: i32) -> (i32, i32, i32) {
    %c0_i32 = arith.constant 0 : i32
    %c0_i32_0 = arith.constant 0 : i32
    return %arg0, %c0_i32, %arg1 : i32, i32, i32
  }
  func.func @transform_2(%arg0: i32, %arg1: i32) -> (i32, i32, i32) {
    %c0_i32 = arith.constant 0 : i32
    %c0_i32_0 = arith.constant 0 : i32
    return %arg0, %c0_i32, %arg1 : i32, i32, i32
  }
  func.func @transform_3(%arg0: i32, %arg1: i32) -> (i32, i32, i32) {
    %c0_i32 = arith.constant 0 : i32
    %c0_i32_0 = arith.constant 0 : i32
    %c0_i32_1 = arith.constant 0 : i32
    return %arg0, %c0_i32, %c0_i32_0 : i32, i32, i32
  }
  func.func @transform_4(%arg0: i32, %arg1: i32) -> (i32, i32, i32) {
    %c0_i32 = arith.constant 0 : i32
    %c0_i32_0 = arith.constant 0 : i32
    %c0_i32_1 = arith.constant 0 : i32
    return %arg0, %c0_i32, %c0_i32_0 : i32, i32, i32
  }
}

</mosaic_0001>

<bundles_post_ra>
// kernel: caculate_t_loss.1
= control target key start
LH: loop header
LB: loop body
LE: loop exit
PB: predicated region body
PF: predicated region fallthrough
CT: control target
= control target key end

     0   :  { %s778_s15 = smov 0   ;;  %s780_s16 = smov 0   ;;  %s930_s0 = inlined_call_operand.vmem [shape: s32[2,1,256], index: 0, kind: input, shape index: {}]   ;;  %s931_s1 = inlined_call_operand.vmem [shape: f32[2,4,256], index: 1, kind: input, shape index: {}]   ;;  %s932_s2 = inlined_call_operand.vmem [shape: f32[2,4,256], index: 2, kind: input, shape index: {}]   ;;  %s933_s3 = inlined_call_operand.vmem [shape: f32[2,1,1], index: 3, kind: output, shape index: {0}]   ;;  %s934_s4 = inlined_call_operand.vmem [shape: f32[2,1,1], index: 4, kind: output, shape index: {1}]  }
   0x1   :  { %s782_s17 = smov 0  }
   0x2 LB: > { %s27_s18 = sadd.s32 1, %s745_s16  ;;  %p672_p0 = scmp.ge.s32.totalorder %s749_s17, 1  ;;  %s749_s17 = sphi %s782_s17, %s15_s17   ;;  %s745_s16 = sphi %s780_s16, %s942_s16   ;;  %s741_s15 = sphi %s778_s15, %s941_s15  }
   0x3   : > { %p29_p1 = scmp.ge.s32.totalorder %s27_s18, 2  ;;  %p217_p2 = scmp.lt.s32.totalorder %s749_s17, 3 }
   0x5   : > { %s944_s18 = smov (%p29_p1, %s27_s18), 0  ;;  %p218_p3 = pnand %p672_p0, %p217_p2 }
   0x6   : > { %p266_p4 = scmp.lt.s32.totalorder (!%p218_p3), %s741_s15, 1  ;;  %v304_v0 = vlaneseq (!%p218_p3)  ;;  %v751_v2 = vmov (!%p218_p3), 0.0   ;;  %vm316_vm1 = vcmask (!%p218_p3), 1043456   ;;  %vm507_vm5 = vcmask (!%p218_p3), 1040384  }
   0x7   : > { %221 = sbr.rel (%p218_p3) target bundleno = 318 (0x13e), region = 32  ;;  %vm521_vm6 = vcmask (!%p218_p3), 0  }
   0x8   : > { %vm798_vm0 = vcmp.lt.s32.totalorder (!%p218_p3), %v304_v0, 256  ;;  %v852_v39 = vshrl.u32 (!%p218_p3), %v304_v0, 7 }
   0x9   : > { %308 = vst.msk [vmem:[#allocation2] sm:$0x3] (!%p218_p3), %vm798_vm0, %v751_v2  ;;  %309 = vst.msk [vmem:[#allocation3] sm:$0x3] (!%p218_p3), %vm798_vm0, %v751_v2 }
   0xa   : > { %v860_v44 = vsub.s32 (!%p218_p3), 0, %v852_v39  ;;  %v864_v46 = vsub.s32 (!%p218_p3), 1, %v852_v39 }
   0xe   : > { %s946_s15 = smov (!%p266_p4, %s741_s15), 1 }
   0xf   : > { %s681_s19 = sshll.u32 %s946_s15, 3  ;;  %s673_s26 = sshll.u32 %s946_s15, 1 }
  0x10   : > { %s282_s22 = scalar_lea.vmem %s931_s1, %s681_s19  ;;  %s292_s25 = scalar_lea.vmem %s932_s2, %s681_s19  ;;  %v487_v29 = vld [vmem:[#allocation3] sm:$0x3] }
  0x11   : > { %v813_v3 = vld [vmem:[%s282_s22] sm:$0xff]  ;;  %s272_s29 = scalar_lea.vmem %s930_s0, %s673_s26  ;;  %s296_s6 = scalar_lea.vmem %s933_s3, %s946_s15 }
  0x12   : > { %v817_v4 = vcombine.high %v813_v3, %v813_v3  ;;  %v317_v5 = vsel %vm316_vm1, %v813_v3, -inf  ;;  %v821_v6 = vld [vmem:[%s292_s25] sm:$0xff]  ;;  %s299_s10 = scalar_lea.vmem %s934_s4, %s946_s15 }
  0x13   : > { %v318_v7 = vrot.slane %v317_v5, 4  ;;  %v825_v8 = vcombine.high %v821_v6, %v821_v6  ;;  %v397_v9 = vsel %vm316_vm1, %v821_v6, -inf  ;;  %v837_v22 = vld [vmem:[%s272_s29] sm:$0x3] }
  0x14   : > { %v324_v10 = vsel %vm316_vm1, %v817_v4, -inf  ;;  %v398_v11 = vrot.slane %v397_v9, 4  ;;  %vm311_vm2 = vcmp.ne.s32.totalorder %v837_v22, 4294967196  ;;  %v366_v48 = vrot.slane %v837_v22, %v860_v44 }
  0x15   : > { %v319_v12 = vmax.f32 %v317_v5, %v318_v7  ;;  %v325_v13 = vrot.slane %v324_v10, 4  ;;  %v404_v15 = vsel %vm316_vm1, %v825_v8, -inf  ;;  %v678_v30 = vsel %vm311_vm2, 1.0, %v751_v2 }
  0x16   : > { %v399_v14 = vmax.f32 %v397_v9, %v398_v11  ;;  %v405_v19 = vrot.slane %v404_v15, 4  ;;  %v490_v35 = vadd.f32 %v678_v30, %v487_v29  ;;  %v370_v49 = vrot.slane %v837_v22, %v864_v46 }
  0x17   : > { %v320_v16 = vrot.slane %v319_v12, 2  ;;  %v326_v17 = vmax.f32 %v324_v10, %v325_v13  ;;  %vm871_vm3 = vcmp.eq.s32.totalorder %v852_v39, %v366_v48 }
  0x18   : > { %v400_v18 = vrot.slane %v399_v14, 2  ;;  %v406_v24 = vmax.f32 %v404_v15, %v405_v19  ;;  %491 = vst.msk [vmem:[#allocation3] sm:$0x3] %vm798_vm0, %v490_v35  ;;  %vm876_vm4 = vcmp.eq.s32.totalorder %v852_v39, %v370_v49  ;;  %v373_v53 = vsel %vm871_vm3, %v813_v3, 0.0 }
  0x19   : > { %v321_v20 = vmax.f32 %v319_v12, %v320_v16  ;;  %v327_v21 = vrot.slane %v326_v17, 2  ;;  %v374_v57 = vsel %vm876_vm4, %v817_v4, 0.0  ;;  %v441_v58 = vsel %vm871_vm3, %v821_v6, 0.0 }
  0x1a   : > { %v401_v23 = vmax.f32 %v399_v14, %v400_v18  ;;  %v407_v28 = vrot.slane %v406_v24, 2  ;;  %v375_v61 = vsel %vm316_vm1, %v373_v53, 0.0  ;;  %v442_v62 = vsel %vm876_vm4, %v825_v8, 0.0 }
  0x1b   : > { %v322_v25 = vrot.slane %v321_v20, 1  ;;  %v328_v26 = vmax.f32 %v326_v17, %v327_v21  ;;  %v382_v4 = vsel %vm316_vm1, %v374_v57, 0.0  ;;  %v443_v7 = vsel %vm316_vm1, %v441_v58, 0.0 }
  0x1c   : > { %v402_v27 = vrot.slane %v401_v23, 1  ;;  %v408_v33 = vmax.f32 %v406_v24, %v407_v28  ;;  %v376_v10 = vrot.slane %v375_v61, 4  ;;  %v450_v14 = vsel %vm316_vm1, %v442_v62, 0.0 }
  0x1d   : > { %v842_v31 = vmax.f32 %v321_v20, %v322_v25  ;;  %v329_v32 = vrot.slane %v328_v26, 1  ;;  %v383_v16 = vrot.slane %v382_v4, 4  ;;  %v444_v17 = vrot.slane %v443_v7, 4 }
  0x1e   : > { %v846_v36 = vmax.f32 %v401_v23, %v402_v27  ;;  %v409_v37 = vrot.slane %v408_v33, 1  ;;  %v377_v23 = vadd.f32 %v376_v10, %v375_v61  ;;  %v451_v24 = vrot.slane %v450_v14, 4 }
  0x1f   : > { %v844_v34 = vmax.f32 %v328_v26, %v329_v32  ;;  %v384_v29 = vadd.f32 %v383_v16, %v382_v4  ;;  %v445_v30 = vadd.f32 %v444_v17, %v443_v7  ;;  %v752_v4 = vmov 1966171168  }
  0x20   : > { %v854_v40 = vmax.f32 %v408_v33, %v409_v37  ;;  %v378_v37 = vrot.slane %v377_v23, 2 }
  0x21   : > { %v333_v38 = vcombine.low %v842_v31, %v844_v34 }
  0x22   : > { %v413_v42 = vcombine.low %v846_v36, %v854_v40  ;;  %v379_v48 = vadd.f32 %v378_v37, %v377_v23  ;;  %v480_v23 = vld [vmem:[#allocation2] sm:$0x3] }
  0x23   : > { %v335_v41 = vsub.f32 %v813_v3, %v333_v38  ;;  %v452_v38 = vadd.f32 %v451_v24, %v450_v14 }
  0x24   : > { %v415_v45 = vsub.f32 %v821_v6, %v413_v42 }
  0x25   : > { %v336_v43 = vmul.f32 1.442695, %v335_v41  ;;  %v453_v49 = vrot.slane %v452_v38, 2 }
  0x26   : > { %v416_v47 = vmul.f32 1.442695, %v415_v45  ;;  %v446_v45 = vrot.slane %v445_v30, 2 }
  0x27   : > { %715 = vpow2.f32 %v336_v43  ;;  %v385_v43 = vrot.slane %v384_v29, 2  ;;  %v454_v53 = vadd.f32 %v453_v49, %v452_v38 }
  0x28   : > { %717 = vpow2.f32 %v416_v47  ;;  %v447_v51 = vadd.f32 %v446_v45, %v445_v30 }
  0x29   : > { %v386_v50 = vadd.f32 %v385_v43, %v384_v29 }
  0x31   : > { %v716_v52 = vpop.eup %715 }
  0x32   : > { %v339_v54 = vcombine.high %v716_v52, %v716_v52  ;;  %v341_v55 = vsel %vm316_vm1, %v716_v52, 0.0  ;;  %v718_v59 = vpop.eup %717  ;;  %v380_v52 = vrot.slane %v379_v48, 1 }
  0x33   : > { %v342_v56 = vrot.slane %v341_v55, 4  ;;  %v419_v2 = vcombine.high %v718_v59, %v718_v59  ;;  %v421_v3 = vsel %vm316_vm1, %v718_v59, 0.0 }
  0x34   : > { %v348_v60 = vsel %vm316_vm1, %v339_v54, 0.0  ;;  %v422_v5 = vrot.slane %v421_v3, 4  ;;  %v381_v59 = vadd.f32 %v380_v52, %v379_v48 }
  0x35   : > { %v343_v63 = vadd.f32 %v342_v56, %v341_v55  ;;  %v349_v0 = vrot.slane %v348_v60, 4  ;;  %v428_v11 = vsel %vm316_vm1, %v419_v2, 0.0  ;;  %v387_v55 = vrot.slane %v386_v50, 1 }
  0x36   : > { %v423_v12 = vadd.f32 %v422_v5, %v421_v3  ;;  %v429_v13 = vrot.slane %v428_v11, 4  ;;  %v448_v56 = vrot.slane %v447_v51, 1  ;;  %v465_v5 = vunpack.c.l.s4 %v752_v4 }
  0x37   : > { %v344_v6 = vrot.slane %v343_v63, 2  ;;  %v350_v9 = vadd.f32 %v349_v0, %v348_v60  ;;  %v455_v60 = vrot.slane %v454_v53, 1  ;;  %v388_v0 = vadd.f32 %v387_v55, %v386_v50 }
  0x38   : > { %v424_v18 = vrot.slane %v423_v12, 2  ;;  %v430_v19 = vadd.f32 %v429_v13, %v428_v11  ;;  %v449_v3 = vadd.f32 %v448_v56, %v447_v51 }
  0x39   : > { %v345_v8 = vadd.f32 %v344_v6, %v343_v63  ;;  %v351_v15 = vrot.slane %v350_v9, 2 }
  0x3a   : > { %v425_v25 = vadd.f32 %v424_v18, %v423_v12  ;;  %v431_v26 = vrot.slane %v430_v19, 2  ;;  %v456_v12 = vadd.f32 %v455_v60, %v454_v53 }
  0x3b   : > { %v346_v20 = vrot.slane %v345_v8, 1  ;;  %v352_v21 = vadd.f32 %v351_v15, %v350_v9  ;;  %v466_v15 = vunpack.c.0.s8 %v465_v5 }
  0x3c   : > { %v426_v32 = vrot.slane %v425_v25, 1  ;;  %v432_v33 = vadd.f32 %v431_v26, %v430_v19 }
  0x3d   : > { %v347_v27 = vadd.f32 %v346_v20, %v345_v8  ;;  %v353_v28 = vrot.slane %v352_v21, 1  ;;  %v469_v18 = vsub.s32 %v466_v15, %v852_v39 }
  0x3e   : > { %v427_v41 = vadd.f32 %v426_v32, %v425_v25  ;;  %v433_v42 = vrot.slane %v432_v33, 1 }
  0x3f   : > { %v354_v35 = vadd.f32 %v353_v28, %v352_v21  ;;  %719 = vlog2.f32 %v347_v27 }
  0x40   : > { %v434_v47 = vadd.f32 %v433_v42, %v432_v33 }
  0x41   : > { %721 = vlog2.f32 %v354_v35 }
  0x42   : > { %723 = vlog2.f32 %v427_v41 }
  0x43   : > { %725 = vlog2.f32 %v434_v47 }
  0x49   : > { %v720_v54 = vpop.eup %719 }
  0x4a   : > { %v356_v57 = vmul.f32 0.6931472, %v720_v54 }
  0x4b   : > { %v722_v58 = vpop.eup %721 }
  0x4c   : > { %v724_v61 = vpop.eup %723  ;;  %v358_v62 = vmul.f32 0.6931472, %v722_v58  ;;  %v359_v63 = vadd.f32 %v356_v57, %v842_v31 }
  0x4d   : > { %v436_v2 = vmul.f32 0.6931472, %v724_v61  ;;  %v726_v7 = vpop.eup %725 }
  0x4e   : > { %v360_v6 = vadd.f32 %v358_v62, %v844_v34  ;;  %v389_v9 = vsub.f32 %v359_v63, %v381_v59  ;;  %v438_v10 = vmul.f32 0.6931472, %v726_v7 }
  0x4f   : > { %v439_v11 = vadd.f32 %v436_v2, %v846_v36  ;;  %v523_v36 = vld [vmem:[#allocation3] sm:$0x3] }
  0x50   : > { %v390_v13 = vsub.f32 %v360_v6, %v388_v0  ;;  %v440_v14 = vadd.f32 %v438_v10, %v854_v40  ;;  %v528_v40 = vrot.slane %v523_v36, %v860_v44  ;;  %v532_v25 = vrot.slane %v523_v36, %v864_v46 }
  0x51   : > { %v457_v8 = vsub.f32 %v439_v11, %v449_v3 }
  0x52   : > { %v458_v16 = vsub.f32 %v440_v14, %v456_v12  ;;  %v535_v30 = vsel %vm507_vm5, %v528_v40, 0.0  ;;  %v536_v22 = vsel %vm507_vm5, %v532_v25, 0.0 }
  0x53   : > { %v459_v31 = vadd.f32 %v457_v8, %v389_v9  ;;  %v537_v33 = vadd.f32 %v536_v22, %v535_v30 }
  0x54   : > { %v460_v17 = vadd.f32 %v458_v16, %v390_v13 }
  0x56   : > { %v463_v19 = vcombine.low %v459_v31, %v460_v17 }
  0x58   : > { %v470_v20 = vrot.slane %v463_v19, %v469_v18 }
  0x5a   : > { %v477_v21 = vrot.slane %v470_v20, %v469_v18 }
  0x5c   : > { %v479_v34 = vsel %vm311_vm2, %v477_v21, 0.0 }
  0x5d   : > { %v481_v24 = vadd.f32 %v480_v23, %v479_v34 }
  0x5f   : > { %486 = vst.msk [vmem:[#allocation2] sm:$0x3] %vm798_vm0, %v481_v24 }
  0x66   : > { %v495_v26 = vld [vmem:[#allocation2] sm:$0x3] }
  0x67   : > { %v500_v39 = vrot.slane %v495_v26, %v860_v44  ;;  %v504_v27 = vrot.slane %v495_v26, %v864_v46 }
  0x69   : > { %v508_v28 = vsel %vm507_vm5, %v500_v39, 0.0  ;;  %v509_v29 = vsel %vm507_vm5, %v504_v27, 0.0 }
  0x6a   : > { %v510_v32 = vadd.f32 %v509_v29, %v508_v28 }
  0x6c   : > { %511 = vadd.xlane.f32.xlu0 %v510_v32 }
  0x70   : > { %538 = vadd.xlane.f32.xlu0 %v537_v33 }
  0xf9   : > { %v512_v1 = vpop.xlane.xlu0 %511 }
  0xfa   : > { %v513_v35 = vrot.slane %v512_v1, 4 }
  0xfc   : > { %v514_v37 = vadd.f32 %v513_v35, %v512_v1 }
  0xfd   : > { %v539_v38 = vpop.xlane.xlu0 %538 }
  0xfe   : > { %v515_v41 = vrot.slane %v514_v37, 2  ;;  %v540_v42 = vrot.slane %v539_v38, 4 }
 0x100   : > { %v541_v43 = vadd.f32 %v540_v42, %v539_v38  ;;  %v516_v44 = vadd.f32 %v515_v41, %v514_v37 }
 0x102   : > { %v542_v45 = vrot.slane %v541_v43, 2  ;;  %v517_v46 = vrot.slane %v516_v44, 1 }
 0x104   : > { %v543_v47 = vadd.f32 %v542_v45, %v541_v43  ;;  %v518_v48 = vadd.f32 %v517_v46, %v516_v44 }
 0x106   : > { %683 = vpush %v518_v48  ;;  %v544_v49 = vrot.slane %v543_v47, 1 }
 0x108   : > { %v545_v50 = vadd.f32 %v544_v49, %v543_v47 }
 0x10a   : > { %685 = vpush %v545_v50 }
 0x137   : > { %s684_s7 = spop %683 }
 0x138   : > { %v520_v51 = vstv %s684_s7 }
 0x139   : > { %522 = vst.msk [vmem:[%s296_s6] sm:$0x1] %vm521_vm6, %v520_v51 }
 0x13b   : > { %s686_s11 = spop %685 }
 0x13c   : > { %v547_v52 = vstv %s686_s11 }
 0x13d   : > { %548 = vst.msk [vmem:[%s299_s10] sm:$0x1] %vm521_vm6, %v547_v52 }
 0x13e PF: > { %s15_s17 = sadd.s32 1, %s749_s17   ;;  %s941_s15 = smov %s745_s16 }
 0x13f   : > { %p12_p5 = scmp.ge.s32.totalorder %s15_s17, 4   ;;  %s942_s16 = smov %s944_s18 }
 0x141   :  { %14 = sbr.rel (!%p12_p5) target bundleno = 2 (0x2), region = 88 }

</bundles_post_ra>
